<compile_context>
chip_gen: v6e
topology: v6e:2x2x1
jax: 0.10.0
libtpu: 0.0.40
codegen_flags: <defaults>
</compile_context>

<pallas_src>
import math

import jax
import jax.numpy as jnp
from jax.experimental import pallas as pl
from jax.experimental.pallas import tpu as pltpu


# ---------------------------------------------------------------------------
# Kernel body (shared by the lane-on-HW and lane-on-O layouts)
# ---------------------------------------------------------------------------
def _make_conv_kernel(mxu_dtype, fuse_bias, fuse_noise, activate,
                      negative_slope, act_gain):
    """Returns kernel(lhs_ref, rhs_ref, [bias_ref], [noise_ref], o_ref).

    y = lhs @ rhs (f32 accumulate); optional epilogue: +noise, +bias,
    leaky_relu * gain; store in o_ref.dtype.  bias/noise refs are shaped so
    plain broadcasting works in either layout.
    """

    def kernel(*refs):
        o_ref = refs[-1]
        lhs_ref, rhs_ref = refs[0], refs[1]
        i = 2
        bias_ref = noise_ref = None
        if fuse_bias:
            bias_ref = refs[i]
            i += 1
        if fuse_noise:
            noise_ref = refs[i]
            i += 1

        y = jnp.dot(lhs_ref[...].astype(mxu_dtype),
                    rhs_ref[...].astype(mxu_dtype),
                    preferred_element_type=jnp.float32)
        if noise_ref is not None:
            y = y + noise_ref[...]
        if bias_ref is not None:
            y = y + bias_ref[...]
        if activate:
            y = jnp.where(y >= 0.0, y, y * negative_slope) * act_gain
        o_ref[...] = y.astype(o_ref.dtype)

    return kernel


# ---------------------------------------------------------------------------
# Sizing helpers
# ---------------------------------------------------------------------------
def _default_vmem_budget():
    """Generation-aware per-kernel VMEM budget (bytes)."""
    cap = None
    try:
        cap = getattr(pltpu.get_tpu_info(), "vmem_capacity_bytes", None)
    except Exception:
        cap = None
    if cap is not None and cap <= 64 * 1024 * 1024:
        # v7x: only 64 MiB physical VMEM -> keep the per-step footprint small.
        return 16 * 1024 * 1024
    # v5e / v6e: 128 MiB physical.
    return 24 * 1024 * 1024


def _auto_mxu_dtype(x_dtype, c, o):
    xd = jnp.dtype(x_dtype)
    if xd == jnp.dtype(jnp.bfloat16):
        return jnp.bfloat16
    if xd == jnp.dtype(jnp.float32) and c >= 256 and o >= 256:
        # Large-channel f32 layers cross from HBM-bound to MXU-bound on
        # v5e/v6e; bf16 MXU operands (f32 accumulate) restore throughput.
        return jnp.bfloat16
    return x_dtype


def _pick_tile_hw(hw, b, c, o, x_itemsize, out_itemsize, budget):
    """Largest lane-dense spatial tile whose full double-buffered footprint fits."""
    if hw <= 128:
        return hw
    usable = int(budget * 0.8)                       # ~20% headroom for Mosaic scratch
    fixed = 2 * o * c * 4                            # double-buffered f32 w_eff block
    per_lane = 2 * (c * x_itemsize + o * out_itemsize) + o * 4  # x+out bufs, f32 staging
    if usable <= fixed + 128 * per_lane:
        cap = 128
    else:
        cap = ((usable - fixed) // per_lane) // 128 * 128
    cap = max(128, min(cap, 4096))                   # throughput plateaus past ~1K lanes

    if hw <= cap:
        tile = hw                                    # single full-extent tile per batch
    else:
        tile = cap
        # Prefer a tile that divides H*W exactly (avoid a masked partial last tile).
        for t in range(cap, cap // 2 - 1, -128):
            if t >= 128 and hw % t == 0:
                tile = t
                break

    # Guarantee >= 2 grid steps so both v7x TensorCores have work.
    while b * pl.cdiv(hw, tile) < 2 and tile > 128:
        new_tile = max(128, ((tile // 2) + 127) // 128 * 128)
        if new_tile == tile:
            break
        tile = new_tile
    return tile


# ---------------------------------------------------------------------------
# Public wrapper
# ---------------------------------------------------------------------------
def modulated_conv2d(x, style, conv_w, mod_w, mod_b, *,
                     demodulate=True,
                     bias=None, noise=None, activate=False,
                     negative_slope=0.2, act_gain=math.sqrt(2.0),
                     tile_hw=None, mxu_dtype=None, buffer_count=None,
                     vmem_budget_bytes=None):
    """ModulatedConv2d.forward (fused path, kernel_size=1, no up/downsample).

    x       : (B, C, H, W)  NCHW input (float32 or bfloat16)
    style   : (B, S)        latent style vectors
    conv_w  : (O, C)        module weight (1, O, C, 1, 1) squeezed
    mod_w   : (C, S)        EqualLinear weight
    mod_b   : (C,)          EqualLinear bias (bias_init=1)
    Optional fused epilogue (defaults off -> exact module semantics):
      noise (broadcastable to (B,1,H,W)) added first, then bias (O,), then
      leaky_relu(negative_slope)*act_gain (FusedLeakyReLU).
    Returns (B, O, H, W) in x.dtype.
    """
    B, C, H, W = x.shape
    O = conv_w.shape[0]
    S = style.shape[1]
    HW = H * W

    # ---- hoisted modulation (tiny; done once in XLA, in float32) ----
    lin_scale = 1.0 / math.sqrt(S)        # EqualLinear scale (lr_mul = 1)
    conv_scale = 1.0 / math.sqrt(C)       # ModulatedConv2d scale, fan_in = C * 1 * 1
    s_mod = (style.astype(jnp.float32) @ (mod_w.astype(jnp.float32) * lin_scale).T
             + mod_b.astype(jnp.float32))                                      # (B, C)
    w_eff = conv_scale * conv_w.astype(jnp.float32)[None] * s_mod[:, None, :]  # (B, O, C)
    if demodulate:
        w_eff = w_eff * jax.lax.rsqrt(
            jnp.sum(w_eff * w_eff, axis=2, keepdims=True) + 1e-8)
    # w_eff stays float32; MXU operands are cast inside the kernel.

    if mxu_dtype is None:
        mxu_dtype = _auto_mxu_dtype(x.dtype, C, O)
    budget = int(vmem_budget_bytes) if vmem_budget_bytes else _default_vmem_budget()
    itemsize = jnp.dtype(x.dtype).itemsize

    fuse_bias = bias is not None
    fuse_noise = noise is not None
    kernel = _make_conv_kernel(mxu_dtype, fuse_bias, fuse_noise, activate,
                               negative_slope, act_gain)

    x_flat = x.reshape(B, C, HW)
    if fuse_noise:
        nz = jnp.broadcast_to(
            jnp.asarray(noise, jnp.float32).reshape(-1, HW), (B, HW))
    if fuse_bias:
        bz = jnp.asarray(bias, jnp.float32).reshape(O)

    # ------------------------------------------------------------------
    # Small-resolution branch (H*W < 128): lane axis = out_channel.
    # (HW, C) @ (C, O) keeps stores lane-dense when O >= 128.
    # ------------------------------------------------------------------
    if HW < 128:
        lhs = jnp.transpose(x_flat, (0, 2, 1))     # (B, HW, C)
        rhs = jnp.transpose(w_eff, (0, 2, 1))      # (B, C, O)
        in_arrays = [lhs, rhs]
        in_specs = [pl.BlockSpec((None, HW, C), lambda b: (b, 0, 0)),
                    pl.BlockSpec((None, C, O), lambda b: (b, 0, 0))]
        if fuse_bias:
            in_arrays.append(bz.reshape(1, O))
            in_specs.append(pl.BlockSpec((1, O), lambda b: (0, 0)))
        if fuse_noise:
            in_arrays.append(nz.reshape(B, HW, 1))
            in_specs.append(pl.BlockSpec((None, HW, 1), lambda b: (b, 0, 0)))

        out_t = pl.pallas_call(
            kernel,
            out_shape=jax.ShapeDtypeStruct((B, HW, O), x.dtype),
            grid_spec=pltpu.PrefetchScalarGridSpec(
                num_scalar_prefetch=0,
                grid=(B,),
                in_specs=in_specs,
                out_specs=pl.BlockSpec((None, HW, O), lambda b: (b, 0, 0))),
            compiler_params=pltpu.CompilerParams(
                dimension_semantics=("parallel",),
                vmem_limit_bytes=budget),
        )(*in_arrays)
        return jnp.transpose(out_t, (0, 2, 1)).reshape(B, O, H, W)

    # ------------------------------------------------------------------
    # Main branch: lane axis = H*W, spatial tiling, grid = (B, n_tiles).
    # ------------------------------------------------------------------
    if tile_hw is None:
        tile_hw = _pick_tile_hw(HW, B, C, O, itemsize, itemsize, budget)
    n_tiles = pl.cdiv(HW, tile_hw)

    # Full per-step footprint: double-buffered x/out tiles + f32 weight block
    # + f32 matmul result staging; pass it (with headroom) as the VMEM limit.
    footprint = (2 * (C + O) * tile_hw * itemsize
                 + 2 * O * C * 4
                 + O * tile_hw * 4)
    vmem_limit = max(budget, int(1.25 * footprint))

    x_spec_kwargs = {}
    if buffer_count is not None:
        # e.g. 3 on v7x to hide per-step DMA issue latency on short tiles.
        x_spec_kwargs["pipeline_mode"] = pl.Buffered(buffer_count)

    in_arrays = [w_eff, x_flat]
    in_specs = [
        # weight block index is invariant along the inner spatial axis -> no re-DMA
        pl.BlockSpec((None, O, C), lambda b, t: (b, 0, 0)),
        pl.BlockSpec((None, C, tile_hw), lambda b, t: (b, 0, t), **x_spec_kwargs),
    ]
    if fuse_bias:
        in_arrays.append(bz.reshape(O, 1))
        in_specs.append(pl.BlockSpec((O, 1), lambda b, t: (0, 0)))
    if fuse_noise:
        in_arrays.append(nz.reshape(B, 1, HW))
        in_specs.append(pl.BlockSpec((None, 1, tile_hw), lambda b, t: (b, 0, t)))

    out = pl.pallas_call(
        kernel,
        out_shape=jax.ShapeDtypeStruct((B, O, HW), x.dtype),
        grid_spec=pltpu.PrefetchScalarGridSpec(
            num_scalar_prefetch=0,
            grid=(B, n_tiles),
            in_specs=in_specs,
            out_specs=pl.BlockSpec((None, O, tile_hw), lambda b, t: (b, 0, t))),
        compiler_params=pltpu.CompilerParams(
            dimension_semantics=("parallel", "parallel"),
            vmem_limit_bytes=vmem_limit),
    )(*in_arrays)
    return out.reshape(B, O, H, W)


# ---------------------------------------------------------------------------
# Pure-JAX reference
# ---------------------------------------------------------------------------
def _reference(x, style, conv_w, mod_w, mod_b, demodulate=True,
               bias=None, noise=None, activate=False,
               negative_slope=0.2, act_gain=math.sqrt(2.0)):
    B, C, H, W = x.shape
    S = style.shape[1]
    xf = x.astype(jnp.float32)
    s = (style.astype(jnp.float32) @ (mod_w.astype(jnp.float32) / math.sqrt(S)).T
         + mod_b.astype(jnp.float32))                                       # (B, C)
    w = (conv_w.astype(jnp.float32)[None] / math.sqrt(C)) * s[:, None, :]   # (B, O, C)
    if demodulate:
        w = w * jax.lax.rsqrt(jnp.sum(w * w, axis=2, keepdims=True) + 1e-8)
    y = jnp.einsum('boc,bchw->bohw', w, xf)
    if noise is not None:
        y = y + jnp.broadcast_to(
            jnp.asarray(noise, jnp.float32).reshape(-1, 1, H, W), y.shape)
    if bias is not None:
        y = y + jnp.asarray(bias, jnp.float32).reshape(1, -1, 1, 1)
    if activate:
        y = jnp.where(y >= 0.0, y, y * negative_slope) * act_gain
    return y


if __name__ == "__main__":
    key = jax.random.PRNGKey(0)
    B, C, O, H, W, S = 2, 4, 8, 16, 16, 32   # batch, in_ch, out_ch, spatial, style_dim

    k_x, k_style, k_convw, k_modw, k_noise, k_bias = jax.random.split(key, 6)
    x = jax.random.normal(k_x, (B, C, H, W), dtype=jnp.float32)
    style = jax.random.normal(k_style, (B, S), dtype=jnp.float32)
    conv_w = jax.random.normal(k_convw, (O, C), dtype=jnp.float32)   # weight(1,O,C,1,1) squeezed
    mod_w = jax.random.normal(k_modw, (C, S), dtype=jnp.float32)     # EqualLinear weight
    mod_b = jnp.ones((C,), dtype=jnp.float32)                        # bias_init=1

    # 1) module default: float32, demodulate=True (main lane-on-HW path)
    out = modulated_conv2d(x, style, conv_w, mod_w, mod_b, demodulate=True)
    jax.block_until_ready(out)
    ref = _reference(x, style, conv_w, mod_w, mod_b, demodulate=True)
    assert out.shape == (B, O, H, W)
    assert jnp.allclose(out, ref, atol=1e-4, rtol=1e-4), "f32 demodulated mismatch"

    # 2) demodulate=False path (e.g. ToRGB configuration)
    out_nd = modulated_conv2d(x, style, conv_w, mod_w, mod_b, demodulate=False)
    jax.block_until_ready(out_nd)
    ref_nd = _reference(x, style, conv_w, mod_w, mod_b, demodulate=False)
    assert jnp.allclose(out_nd, ref_nd, atol=1e-4, rtol=1e-4), "f32 no-demod mismatch"

    # 3) bfloat16 streaming path (bf16 in/out, f32-weight kept, f32 accumulate)
    x_bf16 = x.astype(jnp.bfloat16)
    out_bf16 = modulated_conv2d(x_bf16, style, conv_w, mod_w, mod_b, demodulate=True)
    jax.block_until_ready(out_bf16)
    ref_bf16 = _reference(x_bf16, style, conv_w, mod_w, mod_b, demodulate=True)
    assert out_bf16.dtype == jnp.bfloat16
    assert jnp.allclose(out_bf16.astype(jnp.float32), ref_bf16,
                        atol=5e-2, rtol=5e-2), "bf16 mismatch"

    # 4) small-resolution branch (H*W < 128 -> lane-on-O transposed layout)
    x_small = jax.random.normal(k_x, (B, C, 8, 8), dtype=jnp.float32)
    out_s = modulated_conv2d(x_small, style, conv_w, mod_w, mod_b, demodulate=True)
    jax.block_until_ready(out_s)
    ref_s = _reference(x_small, style, conv_w, mod_w, mod_b, demodulate=True)
    assert jnp.allclose(out_s, ref_s, atol=1e-4, rtol=1e-4), "small-HW mismatch"

    # 5) fused epilogue (noise + bias + FusedLeakyReLU), main path
    noise = 0.1 * jax.random.normal(k_noise, (B, 1, H, W), dtype=jnp.float32)
    bias = 0.1 * jax.random.normal(k_bias, (O,), dtype=jnp.float32)
    out_e = modulated_conv2d(x, style, conv_w, mod_w, mod_b, demodulate=True,
                             bias=bias, noise=noise, activate=True)
    jax.block_until_ready(out_e)
    ref_e = _reference(x, style, conv_w, mod_w, mod_b, demodulate=True,
                       bias=bias, noise=noise, activate=True)
    assert jnp.allclose(out_e, ref_e, atol=1e-4, rtol=1e-4), "fused epilogue mismatch"

    # 6) fused epilogue on the small-resolution (transposed) branch
    noise_s = 0.1 * jax.random.normal(k_noise, (B, 1, 8, 8), dtype=jnp.float32)
    out_se = modulated_conv2d(x_small, style, conv_w, mod_w, mod_b, demodulate=True,
                              bias=bias, noise=noise_s, activate=True)
    jax.block_until_ready(out_se)
    ref_se = _reference(x_small, style, conv_w, mod_w, mod_b, demodulate=True,
                        bias=bias, noise=noise_s, activate=True)
    assert jnp.allclose(out_se, ref_se, atol=1e-4, rtol=1e-4), "small-HW epilogue mismatch"

    print("KERNEL_OK")
</pallas_src>

<mosaic_0001>
module attributes {stable_mosaic.version = 11 : i64} {
  func.func @kernel(%arg0: i32, %arg1: i32, %arg2: memref<1x8x4xf32, #tpu.memory_space<vmem>>, %arg3: memref<1x4x256xf32, #tpu.memory_space<vmem>>, %arg4: memref<1x8x256xf32, #tpu.memory_space<vmem>>) attributes {dimension_semantics = [#tpu.dimension_semantics<parallel>, #tpu.dimension_semantics<parallel>], iteration_bounds = array<i64: 2, 1>, scalar_prefetch = 0 : i64, scratch_operands = 0 : i64, tpu.core_type = #tpu.core_type<tc>, window_params = [{transform_indices = @transform_0, window_bounds = array<i64: 1, 8, 4>}, {transform_indices = @transform_1, window_bounds = array<i64: 1, 4, 256>}, {transform_indices = @transform_2, window_bounds = array<i64: 1, 8, 256>}]} {
    %c0 = arith.constant 0 : index
    %c0_0 = arith.constant 0 : index
    %c0_1 = arith.constant 0 : index
    %0 = vector.load %arg2[%c0, %c0_0, %c0_1] : memref<1x8x4xf32, #tpu.memory_space<vmem>>, vector<1x8x4xf32>
    %1 = vector.shape_cast %0 : vector<1x8x4xf32> to vector<8x4xf32>
    %c0_2 = arith.constant 0 : index
    %c0_3 = arith.constant 0 : index
    %c0_4 = arith.constant 0 : index
    %2 = vector.load %arg3[%c0_2, %c0_3, %c0_4] : memref<1x4x256xf32, #tpu.memory_space<vmem>>, vector<1x4x256xf32>
    %3 = vector.shape_cast %2 : vector<1x4x256xf32> to vector<4x256xf32>
    %cst = arith.constant dense<0.000000e+00> : vector<8x256xf32>
    %4 = tpu.matmul %1, %3, %cst {dimension_numbers = #tpu.dot_dimension_numbers<[1], [0], [0], [1], [0, 0, 1, 1], [], []>} : vector<8x4xf32>, vector<4x256xf32>, vector<8x256xf32> -> vector<8x256xf32>
    %c0_5 = arith.constant 0 : index
    %c0_6 = arith.constant 0 : index
    %c0_7 = arith.constant 0 : index
    %5 = vector.load %arg4[%c0_5, %c0_6, %c0_7] : memref<1x8x256xf32, #tpu.memory_space<vmem>>, vector<1x8x256xf32>
    %6 = vector.shape_cast %5 : vector<1x8x256xf32> to vector<8x256xf32>
    %7 = vector.shape_cast %4 : vector<8x256xf32> to vector<1x8x256xf32>
    tpu.vector_store %arg4[%c0_5, %c0_6, %c0_7], %7 {strides = array<i32>} : memref<1x8x256xf32, #tpu.memory_space<vmem>>, vector<1x8x256xf32>,
    return
  }
  func.func @transform_0(%arg0: i32, %arg1: i32) -> (i32, i32, i32) {
    %c0_i32 = arith.constant 0 : i32
    %c0_i32_0 = arith.constant 0 : i32
    %c0_i32_1 = arith.constant 0 : i32
    return %arg0, %c0_i32, %c0_i32_0 : i32, i32, i32
  }
  func.func @transform_1(%arg0: i32, %arg1: i32) -> (i32, i32, i32) {
    %c0_i32 = arith.constant 0 : i32
    %c0_i32_0 = arith.constant 0 : i32
    return %arg0, %c0_i32, %arg1 : i32, i32, i32
  }
  func.func @transform_2(%arg0: i32, %arg1: i32) -> (i32, i32, i32) {
    %c0_i32 = arith.constant 0 : i32
    %c0_i32_0 = arith.constant 0 : i32
    return %arg0, %c0_i32, %arg1 : i32, i32, i32
  }
}

</mosaic_0001>

<bundles_post_ra>
// kernel: tpu_custom_call.1
= control target key start
LH: loop header
LB: loop body
LE: loop exit
PB: predicated region body
PF: predicated region fallthrough
CT: control target
= control target key end

     0   :  { %7 = vsyncpa [#allocation3], 0  ;;  %s660_s0 = inlined_call_operand.vmem [shape: f32[2,8,4], index: 0, kind: input, shape index: {}]   ;;  %s661_s1 = inlined_call_operand.vmem [shape: f32[2,4,256], index: 1, kind: input, shape index: {}]   ;;  %s662_s2 = inlined_call_operand.hbm [shape: f32[2,8,256], index: 2, kind: output, shape index: {}]  }
   0x1   :  { %9 = vsyncpa [#allocation3 + $0x1], 0  ;;  %s552_s9 = smov 0   ;;  %s554_s10 = smov 0  }
   0x2   :  { %s556_s11 = smov 0   ;;  %s558_s12 = smov 0  }
   0x3   :  { %s560_s13 = smov 0   ;;  %s562_s14 = smov 0  }
   0x4 LB: > { %s381_s15 = sadd.s32 4294967295, %s533_s14   ;;  %s382_s16 = sadd.s32 4294967294, %s533_s14   ;;  %s533_s14 = sphi %s562_s14, %s15_s14   ;;  %s529_s13 = sphi %s560_s13, %s669_s13   ;;  %s525_s12 = sphi %s558_s12, %s668_s12   ;;  %s521_s11 = sphi %s556_s11, %s667_s11   ;;  %s517_s10 = sphi %s554_s10, %s666_s10   ;;  %s513_s9 = sphi %s552_s9, %s665_s9  }
   0x5   : > { %s27_s17 = sadd.s32 1, %s529_s13  ;;  %s90_s18 = sadd.s32 1, %s521_s11 }
   0x6   : > { %p29_p0 = scmp.ge.s32.totalorder %s27_s17, 2  ;;  %p100_p1 = scmp.ne.s32.totalorder %s521_s11, %s517_s10 }
   0x7   : > { %p101_p2 = scmp.eq.s32.totalorder %s381_s15, 1  ;;  %p106_p3 = scmp.ne.s32.totalorder %s517_s10, %s513_s9 }
   0x8   : > { %s671_s17 = smov (%p29_p0, %s27_s17), 0  ;;  %p107_p5 = scmp.eq.s32.totalorder %s382_s16, 1 }
   0x9   : > { %p592_p4 = por %p101_p2, %p100_p1  ;;  %s85_s20 = ssub.s32 %s529_s13, %s671_s17 }
   0xa   : > { %p385_p6 = scmp.ge.s32.totalorder %s533_s14, 1  ;;  %p88_p7 = scmp.eq.s32.totalorder %s85_s20, 0 }
   0xb   : > { %p599_p8 = por %p107_p5, %p106_p3  ;;  %p145_p9 = scmp.lt.s32.totalorder %s533_s14, 3 }
   0xc   : > { %s605_s22 = scalar_select %p88_p7, %s521_s11, %s90_s18  }
   0xd   : > { %p146_p10 = pnand %p385_p6, %p145_p9 }
   0xe   : > { %p175_p11 = scmp.lt.s32.totalorder (!%p146_p10), %s525_s12, 1  ;;  %s172_s3 = sand.u32 (!%p146_p10), 1, %s517_s10  }
   0xf   : > { %149 = sbr.rel (%p146_p10) target bundleno = 237 (0xed), region = 28  ;;  %s386_s4 = sshll.u32 (!%p146_p10), %s172_s3, 4 }
  0x10   : > { %s174_s5 = scalar_lea.vmem (!%p146_p10), [#allocation2], %s386_s4  ;;  %s399_s7 = sshll.u32 (!%p146_p10), %s525_s12, 8 }
  0x11   : > { %s293_s6 = sshll.u32 (!%p146_p10), %s174_s5, 4  ;;  %s291_s16 = scalar_lea.hbm (!%p146_p10), %s662_s2, %s399_s7  ;;  %s617_s6 = int_to_ptr.vmem [resolvable:$true] %s293_s6 }
  0x12   : > { %s277_s18 = scalar_lea.sflag (!%p146_p10), [#allocation3], %s172_s3  ;;  %s457_s20 = scalar_lea.vmem (!%p146_p10), %s617_s6, 256 }
  0x13   : > { %p458_p12 = scmp.ne.s32.totalorder (!%p146_p10), %s617_s6, %s457_s20 }
  0x14   : > { %v535_v0 = vmov 0.0   ;;  %s176_s23 = scalar_select %p175_p11, %s525_s12, 1  ;;  %vm198_vm0 = vcmask 1043456   ;;  %vm194_vm1 = vcmask 31744  }
  0x15   : > { %267 = vmatprep.mubr.f32.mxu0 %v535_v0  ;;  %p459_p13 = pnand %p458_p12, %p592_p4  ;;  %s536_s12 = smov [#allocation2]  }
  0x16   : > { %s387_s24 = sshll.u32 %s176_s23, 3  ;;  %s461_s23 = sshll.u32 %s536_s12, 4  ;;  %s462_s23 = int_to_ptr.vmem [resolvable:$false] %s461_s23 }
  0x17   : > { %s187_s27 = scalar_lea.vmem %s661_s1, %s387_s24  ;;  %s178_s30 = scalar_lea.vmem %s660_s0, %s387_s24 }
  0x18   : > { %v191_v1 = vld [vmem:[%s187_s27] sm:$0xff]  ;;  %p460_p0 = pneg %p459_p13  ;;  %s463_s24 = scalar_lea.vmem %s462_s23, 512 }
  0x19   : > { %v193_v2 = vcombine.high %v191_v1, %v191_v1  ;;  %v190_v3 = vld [vmem:[%s178_s30] sm:$0xff]  ;;  %p464_p1 = scmp.lt.s32.totalorder %s617_s6, %s462_s23  ;;  %p465_p2 = scmp.lt.s32.totalorder %s463_s24, %s457_s20 }
  0x1b   : > { %390 = vmatprep.subr.msk.mxu0 %vm198_vm0, %v193_v2  ;;  %p466_p3 = por %p465_p2, %p464_p1 }
  0x1c   : > { %391 = vmatpush1.msk.msra.mxu0 %vm198_vm0, %v191_v1 }
  0x1d   : > { %392 = vmatmul.mubr.msk.f32.vlgmr.msra.gmra.mxu0 %vm194_vm1, %v190_v3  ;;  %p467_p5 = pnand %p466_p3, %p460_p0 }
  0xdd   : > { %v269_v4 = vpop.f32.mrf.mxu0 }
  0xde   : > { %274 = vst [vmem:[%s174_s5] sm:$0xff] %v269_v4 }
  0xdf   : > { %v271_v5 = vpop.f32.mrf.mxu0 }
  0xe0   : > { %275 = vst [vmem:[%s174_s5 + $0x8] sm:$0xff] %v271_v5 }
  0xe1   : > { %470 = shalt.err (!%p467_p5)
}
  0xe2   : > { %s471_s25 = scalar_lea.hbm %s291_s16, 256  ;;  %s475_s28 = scalar_lea.hbm %s662_s2, 512 }
  0xe3   : > { %p472_p6 = scmp.ne.s32.totalorder %s291_s16, %s471_s25  ;;  %p476_p10 = scmp.lt.s32.totalorder %s291_s16, %s662_s2 }
  0xe4   : > { %p477_p11 = scmp.lt.s32.totalorder %s475_s28, %s471_s25 }
  0xe5   : > { %p473_p7 = pnand %p472_p6, %p592_p4 }
  0xe6   : > { %p478_p12 = por %p477_p11, %p476_p10 }
  0xe7   : > { %p474_p9 = pneg %p473_p7 }
  0xe9   : > { %p479_p13 = pnand %p478_p12, %p474_p9 }
  0xeb   : > { %482 = shalt.err (!%p479_p13)
}
  0xec   : > { %400 = dma.vmem_to_hbm [thread:$0]  (%p592_p4), %s617_s6, 256, %s291_s16, %s277_s18  }
  0xed PF: > { %p406_p0 = scmp.ge.s32.totalorder %s533_s14, 2  ;;  %s305_s3 = sand.u32 1, %s513_s9  }
  0xee   : > { %s306_s4 = scalar_lea.sflag [#allocation3], %s305_s3 }
  0xef   : > { %p403_p1 = pnand %p406_p0, %p599_p8 }
  0xf1   : > { %p404_p2 = pneg %p403_p1 }
  0xf3   : > { %508 = dma.done.wait (%p404_p2), %s306_s4, 256  }
  0xf4   : > { %510 = vsyncadd (%p404_p2), %s306_s4, 4294967040  ;;  %s15_s14 = sadd.s32 1, %s533_s14   ;;  %s665_s9 = smov %s517_s10 }
  0xf5   : > { %p12_p3 = scmp.ge.s32.totalorder %s15_s14, 4   ;;  %s666_s10 = smov %s521_s11 }
  0xf6   : > { %s667_s11 = smov %s605_s22  ;;  %s668_s12 = smov %s529_s13 }
  0xf7   : > { %s669_s13 = smov %s671_s17  ;;  %14 = sbr.rel (!%p12_p3) target bundleno = 4 (0x4), region = 66 }
  0xfc   :  { %311 = vsyncpa [#allocation3], 1 }
  0xfd   :  { %313 = vsyncpa [#allocation3 + $0x1], 1 }

</bundles_post_ra>
